<compile_context>
chip_gen: v6e
topology: v6e:2x2x1
jax: 0.10.0
libtpu: 0.0.40
codegen_flags: <defaults>
</compile_context>

<pallas_src>
import numpy as np
import jax
import jax.numpy as jnp
from jax.experimental import pallas as pl
from jax.experimental.pallas import tpu as pltpu


def _gmm_kernel(offs_ref,            # SMEM [G+1] cumulative row offsets
                gids_ref,            # SMEM [W]   group id per work item
                tids_ref,            # SMEM [W]   m-tile id per work item
                nreal_ref,           # SMEM [1]   number of real (non-padding) work items
                x_ref,               # VMEM (tm, tk)     activation tile
                w_ref,               # VMEM (1, tk, tn)  int8 weight tile of group g
                scale_ref,           # VMEM (1, 1, tn)   f32 scale
                offsc_ref,           # VMEM (1, 1, tn)   f32 offset*scale
                rowsum_ref,          # VMEM (tm, 1)      f32 rowsum(x) (precomputed)
                out_ref,             # VMEM (tm, tn)     output tile
                acc_ref):            # VMEM (tm, tn)     f32 accumulator scratch
    w_idx = pl.program_id(1)
    k_idx = pl.program_id(2)
    k_last = pl.num_programs(2) - 1

    tm = x_ref.shape[0]
    g = gids_ref[w_idx]
    m_tile = tids_ref[w_idx]
    start = offs_ref[g]
    end = offs_ref[g + 1]
    tile_row0 = m_tile * tm

    is_real = w_idx < nreal_ref[0]
    prev_w = jnp.maximum(w_idx - 1, 0)
    first_visit = jnp.logical_or(w_idx == 0, m_tile != tids_ref[prev_w])

    # Real work items always own rows of their tile; padding items never compute.
    has_rows = jnp.logical_and(
        is_real,
        jnp.logical_and(end > tile_row0, start < tile_row0 + tm))
    full_tile = jnp.logical_and(start <= tile_row0, end >= tile_row0 + tm)

    # Zero the output tile on its first visit, unless this step fully overwrites it in
    # the epilogue (interior tiles skip the extra (tm, tn) store; helps v5e's 1 vst slot).
    needs_zero = jnp.logical_and(
        first_visit, jnp.logical_not(jnp.logical_and(has_rows, full_tile)))

    @pl.when(jnp.logical_and(k_idx == 0, needs_zero))
    def _init_out():
        out_ref[...] = jnp.zeros_like(out_ref)

    @pl.when(has_rows)
    def _accumulate():
        # bf16 activations stay bf16 (int8 -> bf16 weight cast is exact for [-128,127]);
        # fp16 / fp32 activations go through an f32 MXU path to preserve precision.
        cdt = jnp.bfloat16 if x_ref.dtype == jnp.bfloat16 else jnp.float32
        prod = jnp.dot(x_ref[...].astype(cdt), w_ref[0].astype(cdt),
                       preferred_element_type=jnp.float32)

        @pl.when(k_idx == 0)
        def _():                      # direct assignment: no zero-init vst + vld
            acc_ref[...] = prod

        @pl.when(k_idx > 0)
        def _():
            acc_ref[...] += prod

    @pl.when(jnp.logical_and(k_idx == k_last, has_rows))
    def _store():
        # Dequant epilogue: y = (x @ w) * scale + rowsum(x) * (offset * scale)
        y = (acc_ref[...] * scale_ref[0]
             + rowsum_ref[...] * offsc_ref[0]).astype(out_ref.dtype)

        @pl.when(full_tile)
        def _():                      # fast path: unmasked, lane-dense store
            out_ref[...] = y

        @pl.when(jnp.logical_not(full_tile))
        def _():                      # boundary tile: masked blend with existing rows
            row = tile_row0 + jax.lax.broadcasted_iota(jnp.int32, (tm, 1), 0)
            mask = jnp.logical_and(row >= start, row < end)
            out_ref[...] = jnp.where(mask, y, out_ref[...])


def _make_group_metadata(offsets, m, tm, num_groups):
    """Megablox-style work-item metadata: which (group, m-tile) each grid step handles."""
    tiles_m = m // tm
    num_work = tiles_m + num_groups - 1        # static upper bound on work items

    starts = offsets[:-1]
    ends = offsets[1:]
    tile_lo = starts // tm
    tile_hi = (ends + tm - 1) // tm
    group_tiles = jnp.where(ends > starts, tile_hi - tile_lo, 0).astype(jnp.int32)
    num_real = jnp.sum(group_tiles).astype(jnp.int32)

    work_idx = jnp.arange(num_work, dtype=jnp.int32)
    gids_real = jnp.repeat(jnp.arange(num_groups, dtype=jnp.int32), group_tiles,
                           total_repeat_length=num_work)
    gids_real = jnp.clip(gids_real, 0, num_groups - 1)
    work_start = jnp.cumsum(group_tiles) - group_tiles           # exclusive prefix
    tids_real = tile_lo[gids_real] + (work_idx - work_start[gids_real])
    tids_real = jnp.clip(tids_real, 0, tiles_m - 1)

    # Padding work items: walk m-tiles past the last group end (so they get zeroed);
    # once past the last tile they repeat the last tile.  They never compute (is_real
    # gating in the kernel) and reuse the last real group id, so consecutive block
    # indices stay constant and Pallas skips issuing new weight/x DMAs for them.
    total = offsets[num_groups]
    tiles_covered = (total + tm - 1) // tm
    tids_pad = jnp.clip(tiles_covered + (work_idx - num_real), 0, tiles_m - 1)

    is_real = work_idx < num_real
    last_real_gid = gids_real[jnp.clip(num_real - 1, 0, num_work - 1)]
    group_ids = jnp.where(is_real, gids_real, last_real_gid).astype(jnp.int32)
    m_tile_ids = jnp.where(is_real, tids_real, tids_pad).astype(jnp.int32)
    num_real_arr = jnp.reshape(num_real, (1,)).astype(jnp.int32)
    return group_ids, m_tile_ids, num_real_arr, num_work


def weight_quant_gmm(x, weight, antiquant_scale, antiquant_offset,
                     group_list, group_list_type, *,
                     tm=128, tn=512, tk=512,
                     vmem_limit_bytes=48 * 1024 * 1024):
    """Pallas TPU implementation of WeightQuantGMMModel.forward."""
    M, K = x.shape
    G, K2, N = weight.shape
    assert K == K2

    tm = min(tm, M)
    tn = min(tn, N)
    tk = min(tk, K)
    assert M % tm == 0 and N % tn == 0 and K % tk == 0, "dims must be multiples of tile sizes"
    assert tm == M or tm % 8 == 0
    assert tn == N or tn % 128 == 0
    assert tk == K or tk % 128 == 0

    gl = group_list.astype(jnp.int32)
    if group_list_type == 1:            # v2: per-group row counts -> cumulative ends
        ends = jnp.cumsum(gl)
    elif group_list_type == 0:          # v1: already cumulative ends
        ends = gl
    else:
        raise ValueError("group_list_type must be 0 or 1")
    offsets = jnp.concatenate(
        [jnp.zeros((1,), jnp.int32), ends.astype(jnp.int32)])    # [G+1]

    group_ids, m_tile_ids, num_real, num_work = _make_group_metadata(offsets, M, tm, G)

    # Hoisted out of the kernel hot loop: scale, offset*scale, and rowsum(x).
    scale_f = antiquant_scale.astype(jnp.float32).reshape(G, 1, N)
    offsc_f = (antiquant_offset.astype(jnp.float32)
               * antiquant_scale.astype(jnp.float32)).reshape(G, 1, N)
    rowsum = jnp.sum(x.astype(jnp.float32), axis=1, keepdims=True)     # [M, 1]

    tiles_n = N // tn
    tiles_k = K // tk
    # NOTE: on v7x the "parallel" n axis shards across the 2 TensorCores; prefer tn such
    # that tiles_n >= 2 when N allows it.

    grid_spec = pltpu.PrefetchScalarGridSpec(
        num_scalar_prefetch=4,
        grid=(tiles_n, num_work, tiles_k),
        in_specs=[
            pl.BlockSpec((tm, tk), lambda n, w, k, offs, gids, tids, nr: (tids[w], k)),
            pl.BlockSpec((1, tk, tn), lambda n, w, k, offs, gids, tids, nr: (gids[w], k, n)),
            pl.BlockSpec((1, 1, tn), lambda n, w, k, offs, gids, tids, nr: (gids[w], 0, n)),
            pl.BlockSpec((1, 1, tn), lambda n, w, k, offs, gids, tids, nr: (gids[w], 0, n)),
            pl.BlockSpec((tm, 1), lambda n, w, k, offs, gids, tids, nr: (tids[w], 0)),
        ],
        out_specs=pl.BlockSpec((tm, tn), lambda n, w, k, offs, gids, tids, nr: (tids[w], n)),
        scratch_shapes=[pltpu.VMEM((tm, tn), jnp.float32)],
    )

    return pl.pallas_call(
        _gmm_kernel,
        out_shape=jax.ShapeDtypeStruct((M, N), x.dtype),
        grid_spec=grid_spec,
        compiler_params=pltpu.CompilerParams(
            dimension_semantics=("parallel", "arbitrary", "arbitrary"),
            vmem_limit_bytes=vmem_limit_bytes),
    )(offsets, group_ids, m_tile_ids, num_real, x, weight, scale_f, offsc_f, rowsum)


def _reference(x, weight, scale, offset, sizes):
    """Pure numpy reference (rows beyond the last group end stay zero)."""
    xf = np.asarray(x, dtype=np.float32)
    wf = np.asarray(weight, dtype=np.float32)
    sf = np.asarray(scale, dtype=np.float32)
    of = np.asarray(offset, dtype=np.float32)
    M, _ = xf.shape
    G, _, N = wf.shape
    y = np.zeros((M, N), dtype=np.float32)
    start = 0
    for g in range(G):
        end = start + int(sizes[g])
        w_deq = (wf[g] + of[g][None, :]) * sf[g][None, :]
        y[start:end] = xf[start:end] @ w_deq
        start = end
    return y


if __name__ == "__main__":
    M, K, N, G = 128, 256, 256, 4
    tm, tn, tk = 64, 128, 128

    key = jax.random.PRNGKey(0)
    k1, k2, k3, k4 = jax.random.split(key, 4)

    x_bf16 = jax.random.normal(k1, (M, K), dtype=jnp.float32).astype(jnp.bfloat16)
    weight = jax.random.randint(k2, (G, K, N), -128, 128, dtype=jnp.int32).astype(jnp.int8)
    antiquant_scale = (jax.random.uniform(k3, (G, N), dtype=jnp.float32) * 0.01
                       + 0.005).astype(jnp.bfloat16)
    antiquant_offset = (jax.random.normal(k4, (G, N), dtype=jnp.float32)
                        * 2.0).astype(jnp.bfloat16)

    # Cases: group boundaries inside a tile, empty groups, and unused tail rows.
    cases = [
        np.array([40, 24, 48, 16], dtype=np.int32),   # sum == M, tile split between groups
        np.array([40, 24, 32, 0], dtype=np.int32),    # empty group + partial tail tile
        np.array([40, 24, 0, 0], dtype=np.int32),     # whole tail tile owned by no group
    ]

    for sizes in cases:
        ref = _reference(x_bf16.astype(jnp.float32), weight,
                         antiquant_scale.astype(jnp.float32),
                         antiquant_offset.astype(jnp.float32), sizes)

        # group_list_type == 1: per-group counts (npu_weight_quant_gmm_v2)
        y1 = weight_quant_gmm(x_bf16, weight, antiquant_scale, antiquant_offset,
                              jnp.asarray(sizes), group_list_type=1,
                              tm=tm, tn=tn, tk=tk)
        y1 = jax.block_until_ready(y1)

        # group_list_type == 0: cumulative ends (npu_weight_quant_gmm)
        y0 = weight_quant_gmm(x_bf16, weight, antiquant_scale, antiquant_offset,
                              jnp.asarray(np.cumsum(sizes).astype(np.int32)),
                              group_list_type=0, tm=tm, tn=tn, tk=tk)
        y0 = jax.block_until_ready(y0)

        np.testing.assert_allclose(np.asarray(y0, dtype=np.float32), ref,
                                   rtol=2e-2, atol=0.5)
        np.testing.assert_allclose(np.asarray(y1, dtype=np.float32), ref,
                                   rtol=2e-2, atol=0.5)
        np.testing.assert_allclose(np.asarray(y0, dtype=np.float32),
                                   np.asarray(y1, dtype=np.float32))

    # Tighter-tolerance check with f32 activations (f32 MXU path in the kernel).
    x_f32 = x_bf16.astype(jnp.float32)
    sizes = cases[0]
    ref32 = _reference(x_f32, weight,
                       antiquant_scale.astype(jnp.float32),
                       antiquant_offset.astype(jnp.float32), sizes)
    y32 = weight_quant_gmm(x_f32, weight, antiquant_scale, antiquant_offset,
                           jnp.asarray(sizes), group_list_type=1,
                           tm=tm, tn=tn, tk=tk)
    y32 = jax.block_until_ready(y32)
    np.testing.assert_allclose(np.asarray(y32, dtype=np.float32), ref32,
                               rtol=1e-3, atol=1e-2)

    print("KERNEL_OK")
</pallas_src>

<mosaic_0001>
module attributes {stable_mosaic.version = 11 : i64} {
  func.func @_gmm_kernel(%arg0: i32, %arg1: i32, %arg2: i32, %arg3: memref<5xi32, #tpu.memory_space<smem>>, %arg4: memref<5xi32, #tpu.memory_space<smem>>, %arg5: memref<5xi32, #tpu.memory_space<smem>>, %arg6: memref<1xi32, #tpu.memory_space<smem>>, %arg7: memref<64x128xbf16, #tpu.memory_space<vmem>>, %arg8: memref<1x128x128xi8, #tpu.memory_space<vmem>>, %arg9: memref<1x1x128xf32, #tpu.memory_space<vmem>>, %arg10: memref<1x1x128xf32, #tpu.memory_space<vmem>>, %arg11: memref<64x1xf32, #tpu.memory_space<vmem>>, %arg12: memref<64x128xbf16, #tpu.memory_space<vmem>>, %arg13: memref<64x128xf32, #tpu.memory_space<vmem>>) attributes {dimension_semantics = [#tpu.dimension_semantics<parallel>, #tpu.dimension_semantics<arbitrary>, #tpu.dimension_semantics<arbitrary>], iteration_bounds = array<i64: 2, 5, 2>, scalar_prefetch = 4 : i64, scratch_operands = 1 : i64, tpu.core_type = #tpu.core_type<tc>, window_params = [{transform_indices = @transform_0, window_bounds = array<i64: 64, 128>}, {transform_indices = @transform_1, window_bounds = array<i64: 1, 128, 128>}, {transform_indices = @transform_2, window_bounds = array<i64: 1, 1, 128>}, {transform_indices = @transform_3, window_bounds = array<i64: 1, 1, 128>}, {transform_indices = @transform_4, window_bounds = array<i64: 64, 1>}, {transform_indices = @transform_5, window_bounds = array<i64: 64, 128>}]} {
    %0 = arith.index_cast %arg1 : i32 to index
    %1 = memref.load %arg4[%0] : memref<5xi32, #tpu.memory_space<smem>>
    %2 = arith.index_cast %arg1 : i32 to index
    %3 = memref.load %arg5[%2] : memref<5xi32, #tpu.memory_space<smem>>
    %4 = arith.index_cast %1 : i32 to index
    %5 = memref.load %arg3[%4] : memref<5xi32, #tpu.memory_space<smem>>
    %c1_i32 = arith.constant 1 : i32
    %6 = arith.addi %1, %c1_i32 : i32
    %7 = arith.index_cast %6 : i32 to index
    %8 = memref.load %arg3[%7] : memref<5xi32, #tpu.memory_space<smem>>
    %c64_i32 = arith.constant 64 : i32
    %9 = arith.muli %3, %c64_i32 : i32
    %c0 = arith.constant 0 : index
    %10 = memref.load %arg6[%c0] : memref<1xi32, #tpu.memory_space<smem>>
    %11 = arith.cmpi slt, %arg1, %10 : i32
    %c1_i32_0 = arith.constant 1 : i32
    %12 = arith.subi %arg1, %c1_i32_0 : i32
    %c0_i32 = arith.constant 0 : i32
    %13 = arith.maxsi %12, %c0_i32 : i32
    %c0_i32_1 = arith.constant 0 : i32
    %14 = arith.cmpi eq, %arg1, %c0_i32_1 : i32
    %15 = arith.index_cast %13 : i32 to index
    %16 = memref.load %arg5[%15] : memref<5xi32, #tpu.memory_space<smem>>
    %17 = arith.cmpi ne, %3, %16 : i32
    %18 = arith.ori %14, %17 : i1
    %19 = arith.cmpi sgt, %8, %9 : i32
    %c64_i32_2 = arith.constant 64 : i32
    %20 = arith.addi %9, %c64_i32_2 : i32
    %21 = arith.cmpi slt, %5, %20 : i32
    %22 = arith.andi %19, %21 : i1
    %23 = arith.andi %11, %22 : i1
    %24 = arith.cmpi sle, %5, %9 : i32
    %c64_i32_3 = arith.constant 64 : i32
    %25 = arith.addi %9, %c64_i32_3 : i32
    %26 = arith.cmpi sge, %8, %25 : i32
    %27 = arith.andi %24, %26 : i1
    %28 = arith.andi %23, %27 : i1
    %true = arith.constant true
    %29 = arith.xori %28, %true : i1
    %30 = arith.andi %18, %29 : i1
    %c0_i32_4 = arith.constant 0 : i32
    %31 = arith.cmpi eq, %arg2, %c0_i32_4 : i32
    %32 = arith.andi %31, %30 : i1
    %33 = arith.extui %32 : i1 to i32
    %c0_i32_5 = arith.constant 0 : i32
    %34 = arith.cmpi ne, %33, %c0_i32_5 : i32
    scf.if %34 {
      %cst = arith.constant 0.000000e+00 : bf16
      %41 = vector.broadcast %cst : bf16 to vector<64x128xbf16>
      %c0_9 = arith.constant 0 : index
      %c0_10 = arith.constant 0 : index
      %42 = vector.load %arg12[%c0_9, %c0_10] : memref<64x128xbf16, #tpu.memory_space<vmem>>, vector<64x128xbf16>
      tpu.vector_store %arg12[%c0_9, %c0_10], %41 {strides = array<i32>} : memref<64x128xbf16, #tpu.memory_space<vmem>>, vector<64x128xbf16>,
    } else {
    }
    %35 = arith.extui %23 : i1 to i32
    %c0_i32_6 = arith.constant 0 : i32
    %36 = arith.cmpi ne, %35, %c0_i32_6 : i32
    scf.if %36 {
      %c0_9 = arith.constant 0 : index
      %c0_10 = arith.constant 0 : index
      %41 = vector.load %arg7[%c0_9, %c0_10] : memref<64x128xbf16, #tpu.memory_space<vmem>>, vector<64x128xbf16>
      %c0_11 = arith.constant 0 : index
      %c0_12 = arith.constant 0 : index
      %c0_13 = arith.constant 0 : index
      %42 = vector.load %arg8[%c0_11, %c0_12, %c0_13] : memref<1x128x128xi8, #tpu.memory_space<vmem>>, vector<1x128x128xi8>
      %43 = vector.shape_cast %42 : vector<1x128x128xi8> to vector<128x128xi8>
      %44 = arith.sitofp %43 : vector<128x128xi8> to vector<128x128xbf16>
      %cst = arith.constant dense<0.000000e+00> : vector<64x128xf32>
      %45 = tpu.matmul %41, %44, %cst {dimension_numbers = #tpu.dot_dimension_numbers<[1], [0], [0], [1], [0, 0, 1, 1], [], []>} : vector<64x128xbf16>, vector<128x128xbf16>, vector<64x128xf32> -> vector<64x128xf32>
      %c0_i32_14 = arith.constant 0 : i32
      %46 = arith.cmpi eq, %arg2, %c0_i32_14 : i32
      %47 = arith.extui %46 : i1 to i32
      %c0_i32_15 = arith.constant 0 : i32
      %48 = arith.cmpi ne, %47, %c0_i32_15 : i32
      scf.if %48 {
        %c0_18 = arith.constant 0 : index
        %c0_19 = arith.constant 0 : index
        %52 = vector.load %arg13[%c0_18, %c0_19] : memref<64x128xf32, #tpu.memory_space<vmem>>, vector<64x128xf32>
        tpu.vector_store %arg13[%c0_18, %c0_19], %45 {strides = array<i32>} : memref<64x128xf32, #tpu.memory_space<vmem>>, vector<64x128xf32>,
      } else {
      }
      %c0_i32_16 = arith.constant 0 : i32
      %49 = arith.cmpi sgt, %arg2, %c0_i32_16 : i32
      %50 = arith.extui %49 : i1 to i32
      %c0_i32_17 = arith.constant 0 : i32
      %51 = arith.cmpi ne, %50, %c0_i32_17 : i32
      scf.if %51 {
        %c0_18 = arith.constant 0 : index
        %c0_19 = arith.constant 0 : index
        %52 = vector.load %arg13[%c0_18, %c0_19] : memref<64x128xf32, #tpu.memory_space<vmem>>, vector<64x128xf32>
        %53 = arith.addf %52, %45 : vector<64x128xf32>
        %c0_20 = arith.constant 0 : index
        %c0_21 = arith.constant 0 : index
        %54 = vector.load %arg13[%c0_20, %c0_21] : memref<64x128xf32, #tpu.memory_space<vmem>>, vector<64x128xf32>
        tpu.vector_store %arg13[%c0_20, %c0_21], %53 {strides = array<i32>} : memref<64x128xf32, #tpu.memory_space<vmem>>, vector<64x128xf32>,
      } else {
      }
    } else {
    }
    %c1_i32_7 = arith.constant 1 : i32
    %37 = arith.cmpi eq, %arg2, %c1_i32_7 : i32
    %38 = arith.andi %37, %23 : i1
    %39 = arith.extui %38 : i1 to i32
    %c0_i32_8 = arith.constant 0 : i32
    %40 = arith.cmpi ne, %39, %c0_i32_8 : i32
    scf.if %40 {
      %c0_9 = arith.constant 0 : index
      %c0_10 = arith.constant 0 : index
      %41 = vector.load %arg13[%c0_9, %c0_10] : memref<64x128xf32, #tpu.memory_space<vmem>>, vector<64x128xf32>
      %c0_11 = arith.constant 0 : index
      %c0_12 = arith.constant 0 : index
      %c0_13 = arith.constant 0 : index
      %42 = vector.load %arg9[%c0_11, %c0_12, %c0_13] : memref<1x1x128xf32, #tpu.memory_space<vmem>>, vector<1x1x128xf32>
      %43 = vector.shape_cast %42 : vector<1x1x128xf32> to vector<1x128xf32>
      %44 = vector.broadcast %43 : vector<1x128xf32> to vector<64x128xf32>
      %45 = arith.mulf %41, %44 : vector<64x128xf32>
      %c0_14 = arith.constant 0 : index
      %c0_15 = arith.constant 0 : index
      %46 = vector.load %arg11[%c0_14, %c0_15] : memref<64x1xf32, #tpu.memory_space<vmem>>, vector<64x1xf32>
      %c0_16 = arith.constant 0 : index
      %c0_17 = arith.constant 0 : index
      %c0_18 = arith.constant 0 : index
      %47 = vector.load %arg10[%c0_16, %c0_17, %c0_18] : memref<1x1x128xf32, #tpu.memory_space<vmem>>, vector<1x1x128xf32>
      %48 = vector.shape_cast %47 : vector<1x1x128xf32> to vector<1x128xf32>
      %49 = vector.broadcast %46 : vector<64x1xf32> to vector<64x128xf32>
      %50 = vector.broadcast %48 : vector<1x128xf32> to vector<64x128xf32>
      %51 = arith.mulf %49, %50 : vector<64x128xf32>
      %52 = arith.addf %45, %51 : vector<64x128xf32>
      %53 = arith.truncf %52 : vector<64x128xf32> to vector<64x128xbf16>
      %54 = arith.extui %27 : i1 to i32
      %c0_i32_19 = arith.constant 0 : i32
      %55 = arith.cmpi ne, %54, %c0_i32_19 : i32
      scf.if %55 {
        %c0_22 = arith.constant 0 : index
        %c0_23 = arith.constant 0 : index
        %59 = vector.load %arg12[%c0_22, %c0_23] : memref<64x128xbf16, #tpu.memory_space<vmem>>, vector<64x128xbf16>
        tpu.vector_store %arg12[%c0_22, %c0_23], %53 {strides = array<i32>} : memref<64x128xbf16, #tpu.memory_space<vmem>>, vector<64x128xbf16>,
      } else {
      }
      %true_20 = arith.constant true
      %56 = arith.xori %27, %true_20 : i1
      %57 = arith.extui %56 : i1 to i32
      %c0_i32_21 = arith.constant 0 : i32
      %58 = arith.cmpi ne, %57, %c0_i32_21 : i32
      scf.if %58 {
        %59 = tpu.iota {dimensions = array<i32: 0>} : vector<64x1xi32>
        %60 = vector.broadcast %9 : i32 to vector<64x1xi32>
        %61 = arith.addi %60, %59 : vector<64x1xi32>
        %62 = vector.broadcast %5 : i32 to vector<64x1xi32>
        %63 = arith.cmpi sge, %61, %62 : vector<64x1xi32>
        %64 = vector.broadcast %8 : i32 to vector<64x1xi32>
        %65 = arith.cmpi slt, %61, %64 : vector<64x1xi32>
        %66 = arith.andi %63, %65 : vector<64x1xi1>
        %c0_22 = arith.constant 0 : index
        %c0_23 = arith.constant 0 : index
        %67 = vector.load %arg12[%c0_22, %c0_23] : memref<64x128xbf16, #tpu.memory_space<vmem>>, vector<64x128xbf16>
        %68 = vector.shape_cast %66 : vector<64x1xi1> to vector<64x1xi1>
        %69 = vector.broadcast %68 : vector<64x1xi1> to vector<64x128xi1>
        %70 = arith.select %69, %53, %67 : vector<64x128xi1>, vector<64x128xbf16>
        %c0_24 = arith.constant 0 : index
        %c0_25 = arith.constant 0 : index
        %71 = vector.load %arg12[%c0_24, %c0_25] : memref<64x128xbf16, #tpu.memory_space<vmem>>, vector<64x128xbf16>
        tpu.vector_store %arg12[%c0_24, %c0_25], %70 {strides = array<i32>} : memref<64x128xbf16, #tpu.memory_space<vmem>>, vector<64x128xbf16>,
      } else {
      }
    } else {
    }
    return
  }
  func.func @transform_0(%arg0: i32, %arg1: i32, %arg2: i32, %arg3: memref<5xi32, #tpu.memory_space<smem>>, %arg4: memref<5xi32, #tpu.memory_space<smem>>, %arg5: memref<5xi32, #tpu.memory_space<smem>>, %arg6: memref<1xi32, #tpu.memory_space<smem>>) -> (i32, i32) {
    %0 = arith.index_cast %arg1 : i32 to index
    %1 = memref.load %arg5[%0] : memref<5xi32, #tpu.memory_space<smem>>
    %c0_i32 = arith.constant 0 : i32
    return %1, %arg2 : i32, i32
  }
  func.func @transform_1(%arg0: i32, %arg1: i32, %arg2: i32, %arg3: memref<5xi32, #tpu.memory_space<smem>>, %arg4: memref<5xi32, #tpu.memory_space<smem>>, %arg5: memref<5xi32, #tpu.memory_space<smem>>, %arg6: memref<1xi32, #tpu.memory_space<smem>>) -> (i32, i32, i32) {
    %0 = arith.index_cast %arg1 : i32 to index
    %1 = memref.load %arg4[%0] : memref<5xi32, #tpu.memory_space<smem>>
    %c0_i32 = arith.constant 0 : i32
    return %1, %arg2, %arg0 : i32, i32, i32
  }
  func.func @transform_2(%arg0: i32, %arg1: i32, %arg2: i32, %arg3: memref<5xi32, #tpu.memory_space<smem>>, %arg4: memref<5xi32, #tpu.memory_space<smem>>, %arg5: memref<5xi32, #tpu.memory_space<smem>>, %arg6: memref<1xi32, #tpu.memory_space<smem>>) -> (i32, i32, i32) {
    %0 = arith.index_cast %arg1 : i32 to index
    %1 = memref.load %arg4[%0] : memref<5xi32, #tpu.memory_space<smem>>
    %c0_i32 = arith.constant 0 : i32
    %c0_i32_0 = arith.constant 0 : i32
    return %1, %c0_i32, %arg0 : i32, i32, i32
  }
  func.func @transform_3(%arg0: i32, %arg1: i32, %arg2: i32, %arg3: memref<5xi32, #tpu.memory_space<smem>>, %arg4: memref<5xi32, #tpu.memory_space<smem>>, %arg5: memref<5xi32, #tpu.memory_space<smem>>, %arg6: memref<1xi32, #tpu.memory_space<smem>>) -> (i32, i32, i32) {
    %0 = arith.index_cast %arg1 : i32 to index
    %1 = memref.load %arg4[%0] : memref<5xi32, #tpu.memory_space<smem>>
    %c0_i32 = arith.constant 0 : i32
    %c0_i32_0 = arith.constant 0 : i32
    return %1, %c0_i32, %arg0 : i32, i32, i32
  }
  func.func @transform_4(%arg0: i32, %arg1: i32, %arg2: i32, %arg3: memref<5xi32, #tpu.memory_space<smem>>, %arg4: memref<5xi32, #tpu.memory_space<smem>>, %arg5: memref<5xi32, #tpu.memory_space<smem>>, %arg6: memref<1xi32, #tpu.memory_space<smem>>) -> (i32, i32) {
    %0 = arith.index_cast %arg1 : i32 to index
    %1 = memref.load %arg5[%0] : memref<5xi32, #tpu.memory_space<smem>>
    %c0_i32 = arith.constant 0 : i32
    %c0_i32_0 = arith.constant 0 : i32
    return %1, %c0_i32 : i32, i32
  }
  func.func @transform_5(%arg0: i32, %arg1: i32, %arg2: i32, %arg3: memref<5xi32, #tpu.memory_space<smem>>, %arg4: memref<5xi32, #tpu.memory_space<smem>>, %arg5: memref<5xi32, #tpu.memory_space<smem>>, %arg6: memref<1xi32, #tpu.memory_space<smem>>) -> (i32, i32) {
    %0 = arith.index_cast %arg1 : i32 to index
    %1 = memref.load %arg5[%0] : memref<5xi32, #tpu.memory_space<smem>>
    %c0_i32 = arith.constant 0 : i32
    return %1, %arg0 : i32, i32
  }
}

</mosaic_0001>

<bundles_post_ra>
// kernel: tpu_custom_call.1
= control target key start
LH: loop header
LB: loop body
LE: loop exit
PB: predicated region body
PF: predicated region fallthrough
CT: control target
= control target key end

     0   :  { %s1779_s30 = smov [#allocation4]   ;;  %s1780_s12 = smov [#allocation5]   ;;  %s2413_s0 = inlined_call_operand.hbm [shape: s32[5], index: 0, kind: input, shape index: {}]   ;;  %s2414_s3 = inlined_call_operand.<no memory space> [shape: s32[1], index: 3, kind: input, shape index: {}]   ;;  %s2415_s4 = inlined_call_operand.vmem [shape: bf16[128,256], index: 4, kind: input, shape index: {}]   ;;  %s2416_s5 = inlined_call_operand.hbm [shape: s8[4,256,256], index: 5, kind: input, shape index: {}]   ;;  %s2417_s6 = inlined_call_operand.vmem [shape: f32[4,1,256], index: 6, kind: input, shape index: {}]   ;;  %s2418_s7 = inlined_call_operand.hbm [shape: f32[4,1,256], index: 7, kind: input, shape index: {}]   ;;  %s2419_s8 = inlined_call_operand.vmem [shape: f32[128,1], index: 8, kind: input, shape index: {}]   ;;  %s2420_s9 = inlined_call_operand.hbm [shape: bf16[128,256], index: 9, kind: output, shape index: {}]   ;;  %s2421_s1 = inlined_call_operand.hbm [shape: s32[5], index: 1, kind: input, shape index: {}]   ;;  %s2422_s2 = inlined_call_operand.hbm [shape: s32[5], index: 2, kind: input, shape index: {}]  }
   0x1   :  { %2449 = sst [smem:[#allocation42_spill]] %s2415_s4  ;;  %s1781_s17 = smov [#allocation6]  }
   0x2   :  { %2450 = sst [smem:[#allocation43_spill]] %s2416_s5 }
   0x3   :  { %2451 = sst [smem:[#allocation44_spill]] %s2417_s6 }
   0x4   :  { %2452 = sst [smem:[#allocation45_spill]] %s2418_s7 }
   0x5   :  { %2453 = sst [smem:[#allocation46_spill]] %s2419_s8 }
   0x6   :  { %2454 = sst [smem:[#allocation47_spill]] %s2420_s9 }
   0x7   :  { %15 = dma.hbm_to_smem %s2413_s0, 16, %s1779_s30, [#allocation3] }
   0x8   :  { %17 = dma.hbm_to_smem %s2421_s1, 16, %s1780_s12, [#allocation3] }
   0x9   :  { %20 = sst [smem:[#allocation7]] %s2414_s3 }
   0xa   :  { %19 = dma.hbm_to_smem %s2422_s2, 16, %s1781_s17, [#allocation3] }
   0xb   :  { %1693 = dma.done.wait [#allocation3], 48 }
   0xc   :  { %1694 = vsyncadd [#allocation3], 4294967248 }
   0xd   :  { %22 = sfence }
   0xe   :  { %23 = vsyncpa [#allocation10], 0 }
   0xf   :  { %25 = vsyncpa [#allocation10 + $0x1], 0 }
  0x10   :  { %26 = vsyncpa [#allocation13], 0 }
  0x11   :  { %28 = vsyncpa [#allocation13 + $0x1], 0 }
  0x12   :  { %29 = vsyncpa [#allocation11], 0 }
  0x13   :  { %31 = vsyncpa [#allocation11 + $0x1], 0  ;;  %s1856_s0 = smov 0   ;;  %s1858_s1 = smov 0  }
  0x14   :  { %s1860_s20 = smov 0   ;;  %s1862_s3 = smov 0  }
  0x15   :  { %s1864_s21 = smov 0   ;;  %s1866_s2 = smov 0  }
  0x16   :  { %s1868_s22 = smov 0   ;;  %s1870_s23 = smov 0  }
  0x17   :  { %s1872_s24 = smov 0   ;;  %s1874_s25 = smov 0  }
  0x18   :  { %s1876_s26 = smov 0   ;;  %s1878_s27 = smov 0  }
  0x19   :  { %s1880_s28 = smov 0   ;;  %s1882_s29 = smov 0  }
  0x1a   :  { %s1884_s30 = smov 0   ;;  %s1886_s10 = smov 0  }
  0x1b   :  { %s1888_s11 = smov 0   ;;  %s1890_s12 = smov 0  }
  0x1c LB: > { %2455 = sst [smem:[#allocation22_spill]] %s1717_s20  ;;  %s49_s14 = sadd.s32 1, %s1765_s30  ;;  %s1777_s12 = sphi %s1890_s12, %s37_s12   ;;  %s1773_s11 = sphi %s1888_s11, %s2531_s11   ;;  %s1769_s10 = sphi %s1886_s10, %s2538_s10   ;;  %s1765_s30 = sphi %s1884_s30, %s2537_s30   ;;  %s1761_s29 = sphi %s1882_s29, %s2527_s29   ;;  %s1757_s28 = sphi %s1880_s28, %s2536_s28   ;;  %s1753_s27 = sphi %s1878_s27, %s2526_s27   ;;  %s1749_s26 = sphi %s1876_s26, %s2525_s26   ;;  %s1745_s25 = sphi %s1874_s25, %s2524_s25   ;;  %s1741_s24 = sphi %s1872_s24, %s2523_s24   ;;  %s1737_s23 = sphi %s1870_s23, %s2522_s23   ;;  %s1733_s22 = sphi %s1868_s22, %s2521_s22   ;;  %s1729_s2 = sphi %s1866_s2, %s2535_s2   ;;  %s1725_s21 = sphi %s1864_s21, %s2534_s21   ;;  %s1721_s3 = sphi %s1862_s3, %s2533_s3   ;;  %s1717_s20 = sphi %s1860_s20, %s2519_s20   ;;  %s1713_s1 = sphi %s1858_s1, %s2532_s1   ;;  %s1709_s0 = sphi %s1856_s0, %s2530_s0  }
  0x1d   : > { %2456 = sst [smem:[#allocation23_spill]] %s1737_s23  ;;  %s52_s15 = sadd.s32 1, %s1769_s10 }
  0x1e   : > { %2457 = sst [smem:[#allocation24_spill]] %s1741_s24  ;;  %p50_p0 = scmp.ge.s32.totalorder %s49_s14, 2 }
  0x1f   : > { %2458 = sst [smem:[#allocation25_spill]] %s1745_s25  ;;  %s56_s16 = sadd.s32 1, %s1773_s11 }
  0x20   : > { %2459 = sst [smem:[#allocation26_spill]] %s1749_s26  ;;  %s2540_s14 = smov (%p50_p0, %s49_s14), 0 }
  0x21   : > { %2460 = sst [smem:[#allocation27_spill]] %s1753_s27  ;;  %s2542_s15 = smov (!%p50_p0, %s52_s15), %s1769_s10 }
  0x22   : > { %2461 = sst [smem:[#allocation28_spill]] %s1757_s28  ;;  %s63_s19 = ssub.s32 %s1765_s30, %s2540_s14 }
  0x23   : > { %2462 = sst [smem:[#allocation29_spill]] %s1761_s29  ;;  %p74_p1 = scmp.ne.s32.totalorder %s1749_s26, %s1745_s25 }
  0x24   : > { %2463 = sst [smem:[#allocation30_spill]] %s1765_s30  ;;  %p54_p2 = scmp.ge.s32.totalorder %s2542_s15, 5 }
  0x25   : > { %2464 = sst [smem:[#allocation31_spill]] %s1773_s11  ;;  %p75_p3 = scmp.eq.s32.totalorder %s1777_s12, 0 }
  0x26   : > { %s60_s17 = sld [smem:[#allocation6 + %s1769_s10]]  ;;  %s99_s9 = sadd.s32 1, %s1741_s24 }
  0x27   : > { %2465 = sst [smem:[#allocation32_spill]] %s2540_s14  ;;  %s2544_s15 = smov (%p54_p2, %s2542_s15), 0 }
  0x28   : > { %s90_s13 = sld [smem:[#allocation5 + %s1769_s10]]  ;;  %s2546_s16 = smov (!%p54_p2, %s56_s16), %s1773_s11 }
  0x29   : > { %2466 = sst [smem:[#allocation33_spill]] %s2544_s15  ;;  %p1968_p4 = por %p75_p3, %p74_p1 }
  0x2a   : > { %s61_s18 = sld [smem:[#allocation6 + %s2544_s15]]  ;;  %p58_p5 = scmp.ge.s32.totalorder %s2546_s16, 2 }
  0x2b   : > { %s91_s14 = sld [smem:[#allocation5 + %s2544_s15]]  ;;  %p106_p6 = scmp.ne.s32.totalorder %s1741_s24, %s1737_s23 }
  0x2c   : > { %p112_p7 = scmp.ne.s32.totalorder %s1737_s23, %s1733_s22  ;;  %s2548_s16 = smov (%p58_p5, %s2546_s16), 0 }
  0x2d   : > { %2468 = sst [smem:[#allocation34_spill]] %s2548_s16  ;;  %p1981_p8 = por %p106_p6, %p75_p3 }
  0x2e   : > { %s2471_s6 = sadd.s32 4294967295, %s1777_s12   ;;  %s1993_s22 = ssub.s32 %s1773_s11, %s2548_s16 }
  0x2f   : > { %s2469_s8 = scalar_select %p1981_p8, 1, 0 }
  0x30   : > { %p1987_p9 = scmp.eq.s32.totalorder %s2471_s6, 0  ;;  %s152_s29 = sld [smem:[#allocation5 + %s1769_s10]] }
  0x31   : > { %2470 = sst [smem:[#allocation35_spill]] %s2469_s8  ;;  %s62_s23 = ssub.s32 %s60_s17, %s61_s18 }
  0x32   : > { %p1998_p10 = por %p1987_p9, %p112_p7  ;;  %s64_s7 = sor.u32 %s63_s19, %s62_s23 }
  0x33   : > { %s92_s6 = ssub.s32 %s90_s13, %s91_s14  ;;  %p65_p11 = scmp.eq.s32.totalorder %s64_s7, 0 }
  0x34   : > { %s2473_s25 = scalar_select %p1998_p10, 1, 0 }
  0x35   : > { %s94_s5 = sor.u32 %s92_s6, %s63_s19  ;;  %s153_s11 = sld [smem:[#allocation5 + %s2544_s15]] }
  0x36   : > { %s96_s16 = sor.u32 %s1993_s22, %s94_s5  ;;  %s2474_s8 = sadd.s32 1, %s1749_s26 }
  0x37   : > { %s2007_s17 = scalar_select %p65_p11, %s1749_s26, %s2474_s8  }
  0x38   : > { %p97_p12 = scmp.eq.s32.totalorder %s96_s16, 0  ;;  %s159_s18 = sadd.s32 1, %s1729_s2 }
  0x39   : > { %2475 = sst [smem:[#allocation36_spill]] %s2007_s17  ;;  %p166_p13 = scmp.ne.s32.totalorder %s1729_s2, %s1725_s21 }
  0x3a   : > { %p172_p0 = scmp.ne.s32.totalorder %s1725_s21, %s1721_s3  ;;  %s210_s13 = sld [smem:[#allocation6 + %s1769_s10]] }
  0x3b   : > { %s2015_s23 = scalar_select %p97_p12, %s1741_s24, %s99_s9  }
  0x3c   : > { %p2019_p1 = por %p166_p13, %p75_p3  ;;  %p2025_p2 = por %p172_p0, %p1987_p9 }
  0x3d   : > { %2476 = sst [smem:[#allocation37_spill]] %s2015_s23  ;;  %s154_s8 = ssub.s32 %s152_s29, %s153_s11 }
  0x3e   : > { %s2478_s7 = scalar_select %p2025_p2, 1, 0 }
  0x3f   : > { %s156_s14 = sor.u32 %s154_s8, %s1993_s22  ;;  %s211_s16 = sld [smem:[#allocation6 + %s2544_s15]] }
  0x40   : > { %s1189_s3 = sadd.s32 4294967294, %s1777_s12   ;;  %p157_p5 = scmp.eq.s32.totalorder %s156_s14, 0 }
  0x41   : > { %p227_p6 = scmp.ne.s32.totalorder %s1717_s20, %s1713_s1  ;;  %s2479_s9 = sadd.s32 4294967295, %s1777_s12  }
  0x42   : > { %p228_p7 = scmp.eq.s32.totalorder %s2479_s9, 19  ;;  %p233_p9 = scmp.ne.s32.totalorder %s1713_s1, %s1709_s0 }
  0x43   : > { %s2038_s19 = scalar_select %p157_p5, %s1729_s2, %s159_s18  }
  0x44   : > { %p2040_p3 = por %p228_p7, %p227_p6  ;;  %p234_p11 = scmp.eq.s32.totalorder %s1189_s3, 19 }
  0x45   : > { %2480 = sst [smem:[#allocation38_spill]] %s2038_s19  ;;  %s212_s28 = ssub.s32 %s210_s13, %s211_s16 }
  0x46   : > { %s2481_s6 = scalar_select %p2040_p3, 1, 0 }
  0x47   : > { %s217_s17 = sadd.s32 1, %s1717_s20  ;;  %s214_s29 = sor.u32 %s212_s28, %s1993_s22 }
  0x48   : > { %2482 = sst [smem:[#allocation39_spill]] %s2481_s6  ;;  %p2048_p12 = por %p234_p11, %p233_p9 }
  0x49   : > { %p215_p13 = scmp.eq.s32.totalorder %s214_s29, 0  ;;  %p1191_p0 = scmp.ge.s32.totalorder %s1777_s12, 20 }
  0x4a   : > { %s2483_s11 = scalar_select %p2048_p12, 1, 0 }
  0x4b   : > { %s2053_s8 = scalar_select %p215_p13, %s1717_s20, %s217_s17  }
  0x4c   : > { %2484 = sst [smem:[#allocation40_spill]] %s2483_s11  ;;  %250 = sbr.rel (%p1191_p0) target bundleno = 164 (0xa4), region = 16 }
  0x4d   : > { %2485 = sst [smem:[#allocation41_spill]] %s2053_s8 }
  0x51   : > { %253 = sbr.rel (!%p1968_p4) target bundleno = 97 (0x61), region = 20  ;;  %s258_s18 = sld [smem:[#allocation6 + %s1769_s10]] (%p1968_p4) }
  0x52   : > { %s255_s13 = sand.u32 (%p1968_p4), 1, %s1749_s26   ;;  %s2486_s4 = sld [smem:[#allocation42_spill]] (%p1968_p4) }
  0x53   : > { %s1192_s14 = sshll.u32 (%p1968_p4), %s255_s13, 5 }
  0x54   : > { %s257_s29 = scalar_lea.vmem (%p1968_p4), [#allocation8], %s1192_s14 }
  0x57   : > { %s1250_s22 = sshll.u32 %s258_s18, 4 }
  0x58   : > { %s261_s16 = sadd.s32 %s1765_s30, %s1250_s22 }
  0x59   : > { %s1195_s3 = sshll.u32 %s261_s16, 2 }
  0x5a   : > { %s263_s17 = scalar_lea.vmem %s2486_s4, %s1195_s3 }
  0x5b   : > { %v280_v0 = vld [vmem:[%s263_s17] sm:$0xf]  ;;  %v282_v1 = vld [vmem:[%s263_s17 + $0x8] sm:$0xf]  ;;  %v284_v2 = vld [vmem:[%s263_s17 + $0x10] sm:$0xf] }
  0x5c   : > { %281 = vst [vmem:[%s257_s29] sm:$0xf] %v280_v0  ;;  %283 = vst [vmem:[%s257_s29 + $0x4] sm:$0xf] %v282_v1  ;;  %v286_v3 = vld [vmem:[%s263_s17 + $0x18] sm:$0xf] }
  0x5d   : > { %285 = vst [vmem:[%s257_s29 + $0x8] sm:$0xf] %v284_v2  ;;  %v288_v4 = vld [vmem:[%s263_s17 + $0x20] sm:$0xf]  ;;  %v290_v5 = vld [vmem:[%s263_s17 + $0x28] sm:$0xf] }
  0x5e   : > { %287 = vst [vmem:[%s257_s29 + $0xc] sm:$0xf] %v286_v3  ;;  %289 = vst [vmem:[%s257_s29 + $0x10] sm:$0xf] %v288_v4  ;;  %v292_v6 = vld [vmem:[%s263_s17 + $0x30] sm:$0xf] }
  0x5f   : > { %291 = vst [vmem:[%s257_s29 + $0x14] sm:$0xf] %v290_v5  ;;  %v294_v7 = vld [vmem:[%s263_s17 + $0x38] sm:$0xf]  ;;  %293 = vst [vmem:[%s257_s29 + $0x18] sm:$0xf] %v292_v6 }
  0x60   : > { %295 = vst [vmem:[%s257_s29 + $0x1c] sm:$0xf] %v294_v7 }
  0x61 PF: > { %s2488_s18 = sld [smem:[#allocation31_spill]]  ;;  %s336_s13 = sand.u32 1, %s1741_s24  }
  0x62   : > { %s1196_s14 = sshll.u32 %s336_s13, 5  ;;  %s1251_s22 = sshll.u32 %s1765_s30, 3 }
  0x63   : > { %s1336_s16 = scalar_select %p1981_p8, [#allocation5], [#allocation15] }
  0x64   : > { %s1337_s3 = scalar_select %p1981_p8, %s1769_s10, 0 }
  0x65   : > { %s340_s9 = scalar_lea.vmem [#allocation9], %s1196_s14  ;;  %s374_s4 = sand.u32 1, %s1729_s2  }
  0x66   : > { %s352_s28 = sshll.u32 %s340_s9, 4  ;;  %s341_s17 = sld [smem:[%s1336_s16 + %s1337_s3]]  ;;  %s2072_s28 = int_to_ptr.vmem [resolvable:$true] %s352_s28 }
  0x67   : > { %s347_s29 = sadd.s32 %s2488_s18, %s1251_s22  ;;  %s2489_s11 = sld [smem:[#allocation43_spill]] }
  0x68   : > { %s1339_s15 = scalar_select %p2019_p1, [#allocation5], [#allocation16] }
  0x69   : > { %s1340_s26 = scalar_select %p2019_p1, %s1769_s10, 0 }
  0x6a   : > { %s2087_s22 = scalar_lea.sflag [#allocation10], %s336_s13 }
  0x6b   : > { %s2080_s19 = sld [smem:[%s1339_s15 + %s1340_s26]] }
  0x6c   : > { %s1199_s23 = sshll.u32 %s341_s17, 4 }
  0x6d   : > { %s349_s24 = sadd.s32 %s1199_s23, %s347_s29  ;;  %s2490_s6 = smov %s2489_s11 }
  0x6e   : > { %s1200_s30 = sshll.u32 %s349_s24, 7  ;;  %s1547_s26 = scalar_lea.hbm %s2490_s6, 8192 }
  0x6f   : > { %s2085_s14 = scalar_lea.hbm %s2489_s11, %s1200_s30 }
  0x70   : > { %s1543_s16 = scalar_lea.hbm %s2085_s14, 512  ;;  %p1548_p7 = scmp.lt.s32.totalorder %s2085_s14, %s2490_s6 }
  0x71   : > { %p1544_p4 = scmp.ne.s32.totalorder %s2085_s14, %s1543_s16  ;;  %p1549_p9 = scmp.lt.s32.totalorder %s1547_s26, %s1543_s16 }
  0x73   : > { %p1545_p5 = pnand %p1544_p4, %p1981_p8  ;;  %p1550_p11 = por %p1549_p9, %p1548_p7 }
  0x75   : > { %p1546_p6 = pneg %p1545_p5 }
  0x77   : > { %p1551_p13 = pnand %p1550_p11, %p1546_p6 }
  0x79   : > { %1554 = shalt.err (!%p1551_p13)
}
  0x7a   : > { %s1555_s20 = scalar_lea.vmem %s2072_s28, 512  ;;  %s1782_s30 = smov [#allocation9]  }
  0x7b   : > { %p1556_p0 = scmp.ne.s32.totalorder %s2072_s28, %s1555_s20  ;;  %s1559_s11 = sshll.u32 %s1782_s30, 4  ;;  %s1560_s11 = int_to_ptr.vmem [resolvable:$false] %s1559_s11 }
  0x7c   : > { %s1561_s8 = scalar_lea.vmem %s1560_s11, 1024  ;;  %p1562_p12 = scmp.lt.s32.totalorder %s2072_s28, %s1560_s11 }
  0x7d   : > { %p1557_p4 = pnand %p1556_p0, %p1981_p8  ;;  %p1563_p3 = scmp.lt.s32.totalorder %s1561_s8, %s1555_s20 }
  0x7f   : > { %p1558_p5 = pneg %p1557_p4  ;;  %p1564_p2 = por %p1563_p3, %p1562_p12 }
  0x81   : > { %p1565_p10 = pnand %p1564_p2, %p1558_p5 }
  0x83   : > { %1568 = shalt.err (!%p1565_p10)
}
  0x84   : > { %s1783_s13 = smov 256   ;;  %s1784_s9 = smov 128  }
  0x85   : > { %s1785_s17 = smov 8   ;;  %s377_s29 = scalar_lea.vmem [#allocation12], %s374_s4 }
  0x86   : > { %1338 = dma.hbm_to_vmem [thread:$0]  (%p1981_p8), %s2085_s14, 512, %s2072_s28, %s2087_s22, %s1783_s13, %s1784_s9, %s1785_s17  }
  0x87   : > { %s387_s16 = sshll.u32 %s377_s29, 4  ;;  %s1201_s3 = sshll.u32 %s2080_s19, 1  ;;  %s388_s16 = int_to_ptr.vmem [resolvable:$true] %s387_s16 }
  0x88   : > { %s383_s23 = sadd.s32 %s2488_s18, %s1201_s3  ;;  %s2491_s20 = sld [smem:[#allocation45_spill]] }
  0x89   : > { %s1202_s26 = sshll.u32 %s383_s23, 4  ;;  %s375_s11 = scalar_lea.sflag [#allocation13], %s374_s4 }
  0x8e   : > { %s2492_s8 = smov %s2491_s20  ;;  %s385_s30 = scalar_lea.hbm %s2491_s20, %s1202_s26 }
  0x8f   : > { %s1569_s6 = scalar_lea.hbm %s385_s30, 16  ;;  %s1573_s14 = scalar_lea.hbm %s2492_s8, 128 }
  0x90   : > { %p1570_p10 = scmp.ne.s32.totalorder %s385_s30, %s1569_s6  ;;  %p1574_p8 = scmp.lt.s32.totalorder %s385_s30, %s2492_s8 }
  0x91   : > { %p1575_p12 = scmp.lt.s32.totalorder %s1573_s14, %s1569_s6 }
  0x92   : > { %p1571_p2 = pnand %p1570_p10, %p2019_p1 }
  0x93   : > { %p1576_p6 = por %p1575_p12, %p1574_p8 }
  0x94   : > { %p1572_p3 = pneg %p1571_p2 }
  0x96   : > { %p1577_p7 = pnand %p1576_p6, %p1572_p3 }
  0x98   : > { %1580 = shalt.err (!%p1577_p7)
}
  0x99   : > { %s1581_s18 = scalar_lea.vmem %s388_s16, 16  ;;  %s1786_s4 = smov [#allocation12]  }
  0x9a   : > { %p1582_p9 = scmp.ne.s32.totalorder %s388_s16, %s1581_s18  ;;  %s1585_s13 = sshll.u32 %s1786_s4, 4  ;;  %s1586_s13 = int_to_ptr.vmem [resolvable:$false] %s1585_s13 }
  0x9b   : > { %s1587_s9 = scalar_lea.vmem %s1586_s13, 32  ;;  %p1588_p0 = scmp.lt.s32.totalorder %s388_s16, %s1586_s13 }
  0x9c   : > { %p1583_p11 = pnand %p1582_p9, %p2019_p1  ;;  %p1589_p4 = scmp.lt.s32.totalorder %s1587_s9, %s1581_s18 }
  0x9e   : > { %p1584_p13 = pneg %p1583_p11  ;;  %p1590_p5 = por %p1589_p4, %p1588_p0 }
  0xa0   : > { %p1591_p10 = pnand %p1590_p5, %p1584_p13 }
  0xa2   : > { %1594 = shalt.err (!%p1591_p10)
}
  0xa3   : > { %1341 = dma.hbm_to_vmem [thread:$0]  (%p2019_p1), %s385_s30, 16, %s388_s16, %s375_s11  }
  0xa4 PF: > { %p1203_p2 = scmp.ge.s32.totalorder %s1777_s12, 1  ;;  %p403_p3 = scmp.lt.s32.totalorder %s1777_s12, 21 }
  0xa6   : > { %p404_p8 = pnand %p1203_p2, %p403_p3 }
  0xa7   : > { %s2493_s6 = sld [smem:[#allocation25_spill]] (!%p404_p8)  ;;  %p2495_p1 = scmp.ne.s32.totalorder (!%p404_p8), %s2473_s25, 0 }
  0xa8   : > { %407 = sbr.rel (%p404_p8) target bundleno = 722 (0x2d2), region = 77  ;;  %s2494_s17 = sld [smem:[#allocation23_spill]] (!%p404_p8) }
  0xad   : > { %s410_s29 = sand.u32 1, %s2493_s6  }
  0xae   : > { %s416_s3 = sand.u32 1, %s2494_s17   ;;  %s1204_s23 = sshll.u32 %s410_s29, 5 }
  0xaf   : > { %s1205_s26 = sshll.u32 %s416_s3, 5  ;;  %s2135_s24 = scalar_lea.vmem [#allocation8], %s1204_s23 }
  0xb0   : > { %s417_s15 = scalar_lea.sflag [#allocation10], %s416_s3  ;;  %s2137_s20 = scalar_lea.vmem [#allocation9], %s1205_s26 }
  0xb1   : > { %1696 = dma.done.wait (%p2495_p1), %s417_s15, 512  }
  0xb2   : > { %1698 = vsyncadd (%p2495_p1), %s417_s15, 4294966784  ;;  %s425_s5 = sand.u32 1, %s1725_s21   ;;  %p2496_p12 = scmp.ne.s32.totalorder %s2478_s7, 0 }
  0xb3   : > { %s426_s16 = scalar_lea.sflag [#allocation13], %s425_s5  ;;  %s2144_s30 = scalar_lea.vmem [#allocation12], %s425_s5 }
  0xb4   : > { %1700 = dma.done.wait (%p2496_p12), %s426_s16, 16  }
  0xb5   : > { %1702 = vsyncadd (%p2496_p12), %s426_s16, 4294967280  ;;  %s2497_s11 = sld [smem:[#allocation29_spill]]  ;;  %s2448_s7 = sand.u32 1, %s1713_s1  }
  0xb6   : > { %s2498_s27 = sld [smem:[#allocation28_spill]]  ;;  %s2162_s4 = sshll.u32 %s2448_s7, 5 }
  0xb7   : > { %s510_s18 = sld [smem:[#allocation7]] }
  0xb8   : > { %s2499_s26 = sld [smem:[#allocation44_spill]] }
  0xb9   : > { %s2501_s23 = sld [smem:[#allocation27_spill]] }
  0xbb   : > { %p484_p6 = scmp.lt.s32.totalorder %s2497_s11, 1 }
  0xbc   : > { %s481_s25 = sld [smem:[#allocation5 + %s2498_s27]]  ;;  %s1211_s28 = sadd.s32 4294967295, %s2498_s27 }
  0xbd   : > { %s2550_s11 = smov (!%p484_p6, %s2497_s11), 1  ;;  %s491_s14 = sld [smem:[#allocation6 + %s2498_s27]] }
  0xbe   : > { %s504_s22 = sld [smem:[#allocation5 + %s2498_s27]]  ;;  %p513_p7 = scmp.gt.s32.totalorder %s1211_s28, 0 }
  0xbf   : > { %s2157_s19 = sld [smem:[#allocation6 + %s2498_s27]]  ;;  %p511_p10 = scmp.lt.s32.totalorder %s2498_s27, %s510_s18 }
  0xc0   : > { %s2552_s28 = smov (!%p513_p7, %s1211_s28), 0  ;;  %p515_p8 = scmp.eq.s32.totalorder %s2498_s27, 0 }
  0xc1   : > { %s2209_s27 = scalar_lea.vmem [#allocation14], %s2162_s4 }
  0xc2   : > { %p482_p9 = scmp.lt.s32.totalorder %s481_s25, 3 }
  0xc3   : > { %s1208_s13 = sshll.u32 %s491_s14, 3 }
  0xc4   : > { %s2554_s25 = smov (!%p482_p9, %s481_s25), 3  ;;  %s2164_s9 = sld [smem:[#allocation4 + %s504_s22]] }
  0xc5   : > { %s1207_s6 = sshll.u32 %s2554_s25, 1  ;;  %p493_p11 = scmp.lt.s32.totalorder %s1208_s13, 15 }
  0xc6   : > { %s2166_s17 = sadd.s32 %s1207_s6, %s2550_s11  ;;  %s507_s29 = sadd.s32 1, %s504_s22 }
  0xc7   : > { %s488_s15 = scalar_lea.vmem %s2499_s26, %s2166_s17  ;;  %s2172_s5 = sld [smem:[#allocation4 + %s507_s29]] }
  0xc8   : > { %s2556_s13 = smov (!%p493_p11, %s1208_s13), 15  ;;  %s2175_s16 = sshll.u32 %s2157_s19, 6 }
  0xc9   : > { %s1209_s11 = sshll.u32 %s2556_s13, 3  ;;  %s516_s25 = sld [smem:[#allocation6 + %s2552_s28]] }
  0xca   : > { %s2500_s6 = sld [smem:[#allocation46_spill]]  ;;  %s520_s3 = sadd.s32 64, %s2175_s16 }
  0xcb   : > { %p521_p13 = scmp.lt.s32.totalorder %s2164_s9, %s520_s3  ;;  %p526_p0 = scmp.le.s32.totalorder %s2164_s9, %s2175_s16 }
  0xcd   : > { %p519_p4 = scmp.gt.s32.totalorder %s2172_s5, %s2175_s16  ;;  %p527_p5 = scmp.ge.s32.totalorder %s2172_s5, %s520_s3 }
  0xcf   : > { %p522_p2 = pnand %p521_p13, %p519_p4  ;;  %p2190_p3 = pnand %p527_p5, %p526_p0 }
  0xd0   : > { %s2180_s7 = scalar_lea.vmem %s2500_s6, %s1209_s11  ;;  %p517_p1 = scmp.ne.s32.totalorder %s2157_s19, %s516_s25 }
  0xd1   : > { %p523_p12 = pneg %p522_p2  ;;  %p529_p7 = pneg %p2190_p3 }
  0xd2   : > { %p518_p9 = por %p517_p1, %p515_p8  ;;  %p535_p4 = scmp.eq.s32.totalorder %s2501_s23, 0 }
  0xd3   : > { %p2196_p6 = pnand %p523_p12, %p511_p10 }
  0xd5   : > { %p525_p11 = pneg %p2196_p6 }
  0xd7   : > { %p530_p13 = pnand %p529_p7, %p525_p11 }
  0xd9   : > { %p533_p0 = pnand %p530_p13, %p518_p9 }
  0xdb   : > { %p534_p5 = pneg %p533_p0 }
  0xdd   : > { %p536_p2 = pnand %p535_p4, %p534_p5 }
  0xdf   : > { %539 = sbr.rel (%p536_p2) target bundleno = 233 (0xe9), region = 93 }
  0xe4   : > { %v1787_v8 = vmov 0  }
  0xe5   : > { %540 = vst [vmem:[%s2209_s27] sm:$0xf] %v1787_v8  ;;  %541 = vst [vmem:[%s2209_s27 + $0x4] sm:$0xf] %v1787_v8 }
  0xe6   : > { %542 = vst [vmem:[%s2209_s27 + $0x8] sm:$0xf] %v1787_v8  ;;  %543 = vst [vmem:[%s2209_s27 + $0xc] sm:$0xf] %v1787_v8 }
  0xe7   : > { %544 = vst [vmem:[%s2209_s27 + $0x10] sm:$0xf] %v1787_v8  ;;  %545 = vst [vmem:[%s2209_s27 + $0x14] sm:$0xf] %v1787_v8 }
  0xe8   : > { %546 = vst [vmem:[%s2209_s27 + $0x18] sm:$0xf] %v1787_v8  ;;  %547 = vst [vmem:[%s2209_s27 + $0x1c] sm:$0xf] %v1787_v8 }
  0xe9 PF: > { %549 = sbr.rel (%p2196_p6) target bundleno = 496 (0x1f0), region = 97 }
  0xee   : > { %v561_v9 = vld [vmem:[%s2137_s20 + $0x18] sm:$0xff]  ;;  %v560_v12 = vld [vmem:[%s2137_s20 + $0x10] sm:$0xff]  ;;  %v1509_v13 = vld [vmem:[%s2135_s24] sm:$0xff]  }
  0xef   : > { %v569_v10 = vunpack.c.h.s8.bf16 %v561_v9  ;;  %v568_v11 = vunpack.c.l.s8.bf16 %v561_v9  ;;  %v1510_v14 = vld [vmem:[%s2135_s24 + $0x10] sm:$0xff]   ;;  %v567_v15 = vunpack.c.h.s8.bf16 %v560_v12  ;;  %1312 = vmatprep.mubr.bf16.mxu0 %v1509_v13  ;;  %v566_v16 = vunpack.c.l.s8.bf16 %v560_v12  ;;  %v559_v17 = vld [vmem:[%s2137_s20 + $0x8] sm:$0xff]  ;;  %v558_v20 = vld [vmem:[%s2137_s20] sm:$0xff]  ;;  %s2504_s20 = sld [smem:[#allocation27_spill]] }
  0xf0   : > { %1316 = vmatprep.mubr.bf16.mxu1 %v1510_v14  ;;  %v565_v18 = vunpack.c.h.s8.bf16 %v559_v17  ;;  %v564_v19 = vunpack.c.l.s8.bf16 %v559_v17  ;;  %v563_v21 = vunpack.c.h.s8.bf16 %v558_v20  ;;  %v562_v22 = vunpack.c.l.s8.bf16 %v558_v20  ;;  %v1511_v23 = vld [vmem:[%s2135_s24 + $0x8] sm:$0xff]   ;;  %v1512_v24 = vld [vmem:[%s2135_s24 + $0x18] sm:$0xff]  }
  0xf1   : > { %1296 = vmatprep.subr.bf16.mxu0 %v569_v10  ;;  %1320 = vmatprep.subr.bf16.mxu1 %v569_v10 }
  0xf2   : > { %1297 = vmatpush3.bf16.msra.mxu0 %v569_v10  ;;  %1328 = vmatpush3.bf16.msra.mxu1 %v569_v10 }
  0xf3   : > { %1298 = vmatprep.subr.bf16.mxu0 %v568_v11  ;;  %1321 = vmatprep.subr.bf16.mxu1 %v568_v11 }
  0xf5   : > { %p1216_p10 = scmp.ne.s32.totalorder %s2504_s20, 0 }
  0xf6   : > { %1299 = vmatpush3.bf16.msra.mxu0 %v568_v11  ;;  %1329 = vmatpush3.bf16.msra.mxu1 %v568_v11 }
  0xf7   : > { %1300 = vmatprep.subr.bf16.mxu0 %v567_v15  ;;  %1322 = vmatprep.subr.bf16.mxu1 %v567_v15 }
  0xfa   : > { %1301 = vmatpush3.bf16.msra.mxu0 %v567_v15  ;;  %1330 = vmatpush3.bf16.msra.mxu1 %v567_v15 }
  0xfb   : > { %1302 = vmatprep.subr.bf16.mxu0 %v566_v16  ;;  %1323 = vmatprep.subr.bf16.mxu1 %v566_v16 }
  0xfe   : > { %1303 = vmatpush3.bf16.msra.mxu0 %v566_v16  ;;  %1331 = vmatpush3.bf16.msra.mxu1 %v566_v16 }
  0xff   : > { %1304 = vmatprep.subr.bf16.mxu0 %v565_v18  ;;  %1324 = vmatprep.subr.bf16.mxu1 %v565_v18 }
 0x102   : > { %1305 = vmatpush3.bf16.msra.mxu0 %v565_v18  ;;  %1332 = vmatpush3.bf16.msra.mxu1 %v565_v18 }
 0x103   : > { %1306 = vmatprep.subr.bf16.mxu0 %v564_v19  ;;  %1325 = vmatprep.subr.bf16.mxu1 %v564_v19 }
 0x106   : > { %1307 = vmatpush3.bf16.msra.mxu0 %v564_v19  ;;  %1333 = vmatpush3.bf16.msra.mxu1 %v564_v19 }
 0x107   : > { %1308 = vmatprep.subr.bf16.mxu0 %v563_v21  ;;  %1326 = vmatprep.subr.bf16.mxu1 %v563_v21 }
 0x10a   : > { %1309 = vmatpush3.bf16.msra.mxu0 %v563_v21  ;;  %1334 = vmatpush3.bf16.msra.mxu1 %v563_v21 }
 0x10b   : > { %1310 = vmatprep.subr.bf16.mxu0 %v562_v22  ;;  %1327 = vmatprep.subr.bf16.mxu1 %v562_v22 }
 0x10e   : > { %1311 = vmatpush3.bf16.msra.mxu0 %v562_v22  ;;  %1335 = vmatpush3.bf16.msra.mxu1 %v562_v22 }
 0x111   : > { %1313 = vmatmul.mubr.bf16.vlgmr.msra.gmra.mxu0 %v1511_v23  ;;  %1317 = vmatmul.mubr.bf16.vlgmr.msra.gmra.mxu1 %v1512_v24 }
 0x1d1   : > { %v1314_v25 = vpop.f32.mrf.mxu0  ;;  %v1318_v26 = vpop.f32.mrf.mxu1 }
 0x1d3   : > { %v628_v27 = vpop.f32.mrf.mxu0  ;;  %v644_v28 = vpop.f32.mrf.mxu1  ;;  %661 = sbr.rel (%p1216_p10) target bundleno = 476 (0x1dc), region = 101 }
 0x1d5   : > { %v1315_v29 = vpop.f32.mrf.mxu0  ;;  %v1319_v30 = vpop.f32.mrf.mxu1 }
 0x1d7   : > { %v631_v31 = vpop.f32.mrf.mxu0  ;;  %v647_v32 = vpop.f32.mrf.mxu1 }
 0x1d8   : > { %662 = vst [vmem:[#allocation2 + $0x30] sm:$0xff] %v628_v27  ;;  %663 = vst [vmem:[#allocation2] sm:$0xff] %v631_v31 }
 0x1d9   : > { %664 = vst [vmem:[#allocation2 + $0x18] sm:$0xff] %v1314_v25  ;;  %665 = vst [vmem:[#allocation2 + $0x10] sm:$0xff] %v1315_v29 }
 0x1da   : > { %666 = vst [vmem:[#allocation2 + $0x8] sm:$0xff] %v644_v28  ;;  %667 = vst [vmem:[#allocation2 + $0x20] sm:$0xff] %v647_v32 }
 0x1db   : > { %668 = vst [vmem:[#allocation2 + $0x28] sm:$0xff] %v1318_v26  ;;  %669 = vst [vmem:[#allocation2 + $0x38] sm:$0xff] %v1319_v30 }
 0x1dc PF: > { %s2505_s24 = sld [smem:[#allocation27_spill]] }
 0x1e2   : > { %p1217_p8 = scmp.le.s32.totalorder %s2505_s24, 0 }
 0x1e4   : > { %673 = sbr.rel (%p1217_p8) target bundleno = 496 (0x1f0), region = 105 }
 0x1e9   : > { %v674_v33 = vld [vmem:[#allocation2 + $0x30] sm:$0xff]  ;;  %v675_v34 = vld [vmem:[#allocation2] sm:$0xff]  ;;  %v676_v35 = vld [vmem:[#allocation2 + $0x18] sm:$0xff] }
 0x1ea   : > { %v682_v36 = vadd.f32 %v674_v33, %v628_v27  ;;  %v683_v37 = vadd.f32 %v675_v34, %v631_v31  ;;  %v684_v38 = vadd.f32 %v1314_v25, %v676_v35  ;;  %v677_v39 = vld [vmem:[#allocation2 + $0x10] sm:$0xff]  ;;  %v678_v40 = vld [vmem:[#allocation2 + $0x8] sm:$0xff]  ;;  %v679_v41 = vld [vmem:[#allocation2 + $0x20] sm:$0xff] }
 0x1eb   : > { %v685_v42 = vadd.f32 %v1315_v29, %v677_v39  ;;  %v686_v43 = vadd.f32 %v678_v40, %v644_v28  ;;  %v687_v44 = vadd.f32 %v679_v41, %v647_v32  ;;  %v680_v45 = vld [vmem:[#allocation2 + $0x28] sm:$0xff]  ;;  %v681_v46 = vld [vmem:[#allocation2 + $0x38] sm:$0xff] }
 0x1ec   : > { %690 = vst [vmem:[#allocation2 + $0x30] sm:$0xff] %v682_v36  ;;  %691 = vst [vmem:[#allocation2] sm:$0xff] %v683_v37  ;;  %v688_v47 = vadd.f32 %v1318_v26, %v680_v45  ;;  %v689_v48 = vadd.f32 %v1319_v30, %v681_v46 }
 0x1ed   : > { %692 = vst [vmem:[#allocation2 + $0x18] sm:$0xff] %v684_v38  ;;  %693 = vst [vmem:[#allocation2 + $0x10] sm:$0xff] %v685_v42 }
 0x1ee   : > { %694 = vst [vmem:[#allocation2 + $0x8] sm:$0xff] %v686_v43  ;;  %695 = vst [vmem:[#allocation2 + $0x20] sm:$0xff] %v687_v44 }
 0x1ef   : > { %696 = vst [vmem:[#allocation2 + $0x28] sm:$0xff] %v688_v47  ;;  %697 = vst [vmem:[#allocation2 + $0x38] sm:$0xff] %v689_v48 }
 0x1f0 PF: > { %s2506_s19 = sld [smem:[#allocation27_spill]] }
 0x1f6   : > { %p698_p1 = scmp.eq.s32.totalorder %s2506_s19, 1 }
 0x1f8   : > { %p699_p12 = pnand %p698_p1, %p525_p11 }
 0x1fa   : > { %702 = sbr.rel (%p699_p12) target bundleno = 688 (0x2b0), region = 109 }
 0x1ff   : > { %v728_v49 = vld [vmem:[%s2180_s7 + $0x10] sm:$0xff]  ;;  %v726_v50 = vld [vmem:[%s2180_s7] sm:$0xff]  ;;  %v1788_v51 = vmov 0   ;;  %v729_v52 = vld [vmem:[%s2180_s7 + $0x18] sm:$0xff] }
 0x200   : > { %1514 = vset.pattern.permute.xlu1 %v1788_v51  ;;  %1513 = vset.pattern.permute.xlu0 %v1788_v51  ;;  %v727_v53 = vld [vmem:[%s2180_s7 + $0x8] sm:$0xff]  ;;  %v730_v55 = vld [vmem:[%s2180_s7 + $0x20] sm:$0xff]  ;;  %v733_v56 = vld [vmem:[%s2180_s7 + $0x38] sm:$0xff] }
 0x201   : > { %747 = vperm.xlu1 %1514, %v728_v49   ;;  %737 = vperm.xlu0 %1513, %v726_v50   ;;  %v731_v54 = vld [vmem:[%s2180_s7 + $0x28] sm:$0xff]  ;;  %v732_v57 = vld [vmem:[%s2180_s7 + $0x30] sm:$0xff]  ;;  %v705_v58 = vld [vmem:[#allocation2 + $0x18] sm:$0xff] }
 0x202   : > { %v1218_v59 = vld [vmem:[%s488_s15] ss:$0 sm:$0xff]  ;;  %v703_v60 = vld [vmem:[#allocation2 + $0x30] sm:$0xff]  ;;  %v707_v9 = vld [vmem:[#allocation2 + $0x8] sm:$0xff] }
 0x203   : > { %v1219_v61 = vld [vmem:[%s2144_s30] ss:$0 sm:$0xff]  ;;  %v706_v0 = vld [vmem:[#allocation2 + $0x10] sm:$0xff]  ;;  %v720_v2 = vmul.f32 %v1218_v59, %v705_v58  ;;  %v718_v3 = vmul.f32 %v1218_v59, %v703_v60  ;;  %v722_v15 = vmul.f32 %v1218_v59, %v707_v9  ;;  %v710_v22 = vld [vmem:[#allocation2 + $0x38] sm:$0xff] }
 0x204   : > { %v704_v1 = vld [vmem:[#allocation2] sm:$0xff]  ;;  %v721_v6 = vmul.f32 %v1218_v59, %v706_v0  ;;  %v709_v23 = vld [vmem:[#allocation2 + $0x28] sm:$0xff]  ;;  %v725_v30 = vmul.f32 %v1218_v59, %v710_v22 }
 0x205   : > { %752 = vperm.xlu1 %1514, %v729_v52   ;;  %742 = vperm.xlu0 %1513, %v727_v53   ;;  %v719_v7 = vmul.f32 %v1218_v59, %v704_v1  ;;  %v708_v8 = vld [vmem:[#allocation2 + $0x20] sm:$0xff]  ;;  %v724_v31 = vmul.f32 %v1218_v59, %v709_v23 }
 0x206   : > { %v723_v14 = vmul.f32 %v1218_v59, %v708_v8 }
 0x209   : > { %762 = vperm.xlu1 %1514, %v731_v54   ;;  %757 = vperm.xlu0 %1513, %v730_v55  }
 0x20d   : > { %772 = vperm.xlu1 %1514, %v733_v56   ;;  %767 = vperm.xlu0 %1513, %v732_v57  }
 0x27c   : > { %v748_v62 = vpop.permute.xlu1 %747  ;;  %v738_v63 = vpop.permute.xlu0 %737 }
 0x27d   : > { %v783_v4 = vmul.f32 %v1219_v61, %v748_v62  ;;  %v781_v5 = vmul.f32 %v1219_v61, %v738_v63 }
 0x27f   : > { %v791_v16 = vadd.f32 %v783_v4, %v720_v2  ;;  %v789_v17 = vadd.f32 %v781_v5, %v718_v3 }
 0x280   : > { %v753_v10 = vpop.permute.xlu1 %752  ;;  %v743_v11 = vpop.permute.xlu0 %742 }
 0x281   : > { %v784_v12 = vmul.f32 %v1219_v61, %v753_v10  ;;  %v782_v13 = vmul.f32 %v1219_v61, %v743_v11 }
 0x283   : > { %v792_v18 = vadd.f32 %v784_v12, %v721_v6  ;;  %v790_v19 = vadd.f32 %v782_v13, %v719_v7 }
 0x284   : > { %v763_v20 = vpop.permute.xlu1 %762  ;;  %v758_v21 = vpop.permute.xlu0 %757 }
 0x285   : > { %v2249_v24 = vpack.c.bf16 %v792_v18, %v791_v16  ;;  %v2251_v25 = vpack.c.bf16 %v790_v19, %v789_v17  ;;  %v786_v26 = vmul.f32 %v1219_v61, %v763_v20  ;;  %v785_v27 = vmul.f32 %v1219_v61, %v758_v21 }
 0x287   : > { %v794_v28 = vadd.f32 %v786_v26, %v723_v14  ;;  %v793_v29 = vadd.f32 %v785_v27, %v722_v15 }
 0x288   : > { %v773_v32 = vpop.permute.xlu1 %772  ;;  %v768_v33 = vpop.permute.xlu0 %767 }
 0x289   : > { %v2253_v34 = vpack.c.bf16 %v794_v28, %v793_v29  ;;  %v788_v35 = vmul.f32 %v1219_v61, %v773_v32  ;;  %v787_v36 = vmul.f32 %v1219_v61, %v768_v33  ;;  %802 = sbr.rel (%p2190_p3) target bundleno = 656 (0x290), region = 113 }
 0x28b   : > { %v796_v37 = vadd.f32 %v788_v35, %v725_v30  ;;  %v795_v38 = vadd.f32 %v787_v36, %v724_v31 }
 0x28d   : > { %v2255_v39 = vpack.c.bf16 %v796_v37, %v795_v38 }
 0x28e   : > { %1265 = vst [vmem:[%s2209_s27] sm:$0xff] %v2251_v25   ;;  %1281 = vst [vmem:[%s2209_s27 + $0x8] sm:$0xff] %v2249_v24  }
 0x28f   : > { %1282 = vst [vmem:[%s2209_s27 + $0x10] sm:$0xff] %v2253_v34   ;;  %1283 = vst [vmem:[%s2209_s27 + $0x18] sm:$0xff] %v2255_v39  }
 0x290 PF: > { %841 = sbr.rel (!%p2190_p3) target bundleno = 688 (0x2b0), region = 117  ;;  %v842_v40 = vlaneseq (%p2190_p3)  ;;  %v851_v41 = vstv (%p2190_p3), %s2175_s16  ;;  %v2271_v43 = vstv (%p2190_p3), %s2164_s9  ;;  %v2274_v44 = vstv (%p2190_p3), %s2172_s5 }
 0x291   : > { %v1789_v57 = vmov (%p2190_p3), 0  }
 0x292   : > { %v843_v42 = vshrl.u32 (%p2190_p3), %v842_v40, 7 }
 0x294   : > { %v844_v45 = vadd.s32 (%p2190_p3), 8, %v843_v42  ;;  %v852_v46 = vadd.s32 (%p2190_p3), %v851_v41, %v843_v42  ;;  %v845_v47 = vadd.s32 (%p2190_p3), 16, %v843_v42  ;;  %v846_v48 = vadd.s32 (%p2190_p3), 24, %v843_v42 }
 0x295   : > { %v847_v49 = vadd.s32 32, %v843_v42  ;;  %v848_v50 = vadd.s32 40, %v843_v42  ;;  %v849_v55 = vadd.s32 48, %v843_v42  ;;  %v850_v56 = vadd.s32 56, %v843_v42 }
 0x296   : > { %v853_v51 = vadd.s32 %v851_v41, %v844_v45  ;;  %vm861_vm0 = vcmp.ge.s32.totalorder %v852_v46, %v2271_v43  ;;  %vm870_vm1 = vcmp.lt.s32.totalorder %v852_v46, %v2274_v44  ;;  %v854_v52 = vadd.s32 %v851_v41, %v845_v47  ;;  %v1517_v11 = vld [vmem:[%s2209_s27 + $0x10] sm:$0xff]   ;;  %v1518_v18 = vld [vmem:[%s2209_s27 + $0x18] sm:$0xff]  }
 0x297   : > { %vm878_vm2 = vmand %vm861_vm0, %vm870_vm1  ;;  %v855_v53 = vadd.s32 %v851_v41, %v846_v48  ;;  %v856_v54 = vadd.s32 %v851_v41, %v847_v49  ;;  %v857_v59 = vadd.s32 %v851_v41, %v848_v50  ;;  %v1515_v61 = vld [vmem:[%s2209_s27] sm:$0xff]   ;;  %v858_v62 = vadd.s32 %v851_v41, %v849_v55  ;;  %v1516_v4 = vld [vmem:[%s2209_s27 + $0x8] sm:$0xff]  }
 0x298   : > { %vm862_vm3 = vcmp.ge.s32.totalorder %v853_v51, %v2271_v43  ;;  %vm871_vm4 = vcmp.lt.s32.totalorder %v853_v51, %v2274_v44  ;;  %vm910_vm5 = vmpackc.low %vm878_vm2, %vm878_vm2  ;;  %vm863_vm6 = vcmp.ge.s32.totalorder %v854_v52, %v2271_v43  ;;  %vm872_vm7 = vcmp.lt.s32.totalorder %v854_v52, %v2274_v44 }
 0x299   : > { %vm879_vm8 = vmand %vm862_vm3, %vm871_vm4  ;;  %v918_v58 = vsel %vm910_vm5, 65537, %v1789_v57  ;;  %vm864_vm9 = vcmp.ge.s32.totalorder %v855_v53, %v2271_v43  ;;  %vm873_vm10 = vcmp.lt.s32.totalorder %v855_v53, %v2274_v44  ;;  %vm865_vm14 = vcmp.ge.s32.totalorder %v856_v54, %v2271_v43 }
 0x29a   : > { %vm911_vm11 = vmpackc.low %vm879_vm8, %vm879_vm8  ;;  %vm874_vm15 = vcmp.lt.s32.totalorder %v856_v54, %v2274_v44  ;;  %vm866_vm1 = vcmp.ge.s32.totalorder %v857_v59, %v2271_v43  ;;  %vm875_vm2 = vcmp.lt.s32.totalorder %v857_v59, %v2274_v44  ;;  %v859_v0 = vadd.s32 %v851_v41, %v850_v56 }
 0x29b   : > { %v919_v60 = vsel %vm911_vm11, 65537, %v1789_v57  ;;  %vm880_vm12 = vmand %vm863_vm6, %vm872_vm7  ;;  %vm867_vm6 = vcmp.ge.s32.totalorder %v858_v62, %v2271_v43  ;;  %vm876_vm8 = vcmp.lt.s32.totalorder %v858_v62, %v2274_v44 }
 0x29c   : > { %v1228_v63 = vcombine.low %v918_v58, %v919_v60  ;;  %vm881_vm13 = vmand %vm864_vm9, %vm873_vm10  ;;  %vm868_vm10 = vcmp.ge.s32.totalorder %v859_v0, %v2271_v43  ;;  %vm877_vm11 = vcmp.lt.s32.totalorder %v859_v0, %v2274_v44 }
 0x29d   : > { %vm912_vm0 = vmpackc.low %vm880_vm12, %vm880_vm12 }
 0x29e   : > { %vm938_vm3 = vcmp.ne.s16.totalorder %v1228_v63, 0  ;;  %vm913_vm4 = vmpackc.low %vm881_vm13, %vm881_vm13  ;;  %v920_v1 = vsel %vm912_vm0, 65537, %v1789_v57 }
 0x29f   : > { %v966_v2 = vsel %vm938_vm3, %v2251_v25, %v1515_v61  ;;  %v921_v3 = vsel %vm913_vm4, 65537, %v1789_v57  ;;  %vm882_vm5 = vmand %vm865_vm14, %vm874_vm15 }
 0x2a0   : > { %v1236_v5 = vcombine.low %v966_v2, %v966_v2  ;;  %v1237_v6 = vcombine.high %v966_v2, %v966_v2  ;;  %v1229_v7 = vcombine.low %v920_v1, %v921_v3  ;;  %vm883_vm7 = vmand %vm866_vm1, %vm875_vm2 }
 0x2a1   : > { %vm914_vm9 = vmpackc.low %vm882_vm5, %vm882_vm5 }
 0x2a2   : > { %998 = vst [vmem:[%s2209_s27] sm:$0xf] %v1236_v5  ;;  %999 = vst [vmem:[%s2209_s27 + $0x4] sm:$0xf] %v1237_v6  ;;  %vm939_vm12 = vcmp.ne.s16.totalorder %v1229_v7, 0  ;;  %v922_v8 = vsel %vm914_vm9, 65537, %v1789_v57 }
 0x2a3   : > { %vm915_vm13 = vmpackc.low %vm883_vm7, %vm883_vm7  ;;  %v967_v9 = vsel %vm939_vm12, %v2249_v24, %v1516_v4 }
 0x2a4   : > { %v923_v10 = vsel %vm915_vm13, 65537, %v1789_v57  ;;  %vm884_vm14 = vmand %vm867_vm6, %vm876_vm8  ;;  %v1238_v12 = vcombine.low %v967_v9, %v967_v9  ;;  %v1239_v13 = vcombine.high %v967_v9, %v967_v9 }
 0x2a5   : > { %v1230_v14 = vcombine.low %v922_v8, %v923_v10  ;;  %vm885_vm15 = vmand %vm868_vm10, %vm877_vm11 }
 0x2a6   : > { %vm916_vm0 = vmpackc.low %vm884_vm14, %vm884_vm14  ;;  %1000 = vst [vmem:[%s2209_s27 + $0x8] sm:$0xf] %v1238_v12 }
 0x2a7   : > { %1001 = vst [vmem:[%s2209_s27 + $0xc] sm:$0xf] %v1239_v13  ;;  %vm940_vm1 = vcmp.ne.s16.totalorder %v1230_v14, 0  ;;  %vm917_vm2 = vmpackc.low %vm885_vm15, %vm885_vm15  ;;  %v924_v15 = vsel %vm916_vm0, 65537, %v1789_v57 }
 0x2a8   : > { %v968_v16 = vsel %vm940_vm1, %v2253_v34, %v1517_v11  ;;  %v925_v17 = vsel %vm917_vm2, 65537, %v1789_v57 }
 0x2a9   : > { %v1240_v19 = vcombine.low %v968_v16, %v968_v16  ;;  %v1241_v20 = vcombine.high %v968_v16, %v968_v16  ;;  %v1231_v21 = vcombine.low %v924_v15, %v925_v17 }
 0x2ab   : > { %1002 = vst [vmem:[%s2209_s27 + $0x10] sm:$0xf] %v1240_v19  ;;  %1003 = vst [vmem:[%s2209_s27 + $0x14] sm:$0xf] %v1241_v20  ;;  %vm941_vm3 = vcmp.ne.s16.totalorder %v1231_v21, 0 }
 0x2ac   : > { %v969_v22 = vsel %vm941_vm3, %v2255_v39, %v1518_v18 }
 0x2ad   : > { %v1242_v23 = vcombine.low %v969_v22, %v969_v22  ;;  %v1243_v24 = vcombine.high %v969_v22, %v969_v22 }
 0x2af   : > { %1004 = vst [vmem:[%s2209_s27 + $0x18] sm:$0xf] %v1242_v23  ;;  %1005 = vst [vmem:[%s2209_s27 + $0x1c] sm:$0xf] %v1243_v24 }
 0x2b0 PF: > { %s2508_s30 = sld [smem:[#allocation39_spill]]  ;;  %s1023_s15 = sshll.u32 %s2209_s27, 4  ;;  %s2316_s15 = int_to_ptr.vmem [resolvable:$true] %s1023_s15 }
 0x2b1   : > { %s2510_s7 = sld [smem:[#allocation28_spill]]  ;;  %s2514_s23 = sand.u32 1, %s1713_s1  }
 0x2b2   : > { %s2511_s9 = sld [smem:[#allocation29_spill]]  ;;  %s2326_s29 = scalar_lea.sflag [#allocation11], %s2514_s23 }
 0x2b3   : > { %s2512_s22 = sld [smem:[#allocation47_spill]]  ;;  %s1595_s28 = scalar_lea.vmem %s2316_s15, 512 }
 0x2b4   : > { %p1596_p6 = scmp.ne.s32.totalorder %s2316_s15, %s1595_s28  ;;  %s1790_s27 = smov [#allocation14]  }
 0x2b5   : > { %s1599_s20 = sshll.u32 %s1790_s27, 4  ;;  %s1600_s20 = int_to_ptr.vmem [resolvable:$false] %s1599_s20 }
 0x2b6   : > { %p2509_p3 = scmp.ne.s32.totalorder %s2508_s30, 0  ;;  %s1601_s24 = scalar_lea.vmem %s1600_s20, 1024 }
 0x2b7   : > { %p1602_p11 = scmp.lt.s32.totalorder %s2316_s15, %s1600_s20  ;;  %p1603_p13 = scmp.lt.s32.totalorder %s1601_s24, %s1595_s28 }
 0x2b8   : > { %s1344_s17 = scalar_select %p2509_p3, [#allocation6], [#allocation17] }
 0x2b9   : > { %s2558_s7 = smov (!%p2509_p3, %s2510_s7), 0  ;;  %s2513_s6 = smov %s2512_s22 }
 0x2ba   : > { %s1014_s26 = sld [smem:[%s1344_s17 + %s2558_s7]]  ;;  %p1597_p7 = pnand %p1596_p6, %p2509_p3 }
 0x2bb   : > { %p1604_p0 = por %p1603_p13, %p1602_p11 }
 0x2bc   : > { %p1598_p9 = pneg %p1597_p7 }
 0x2be   : > { %p1605_p4 = pnand %p1604_p0, %p1598_p9 }
 0x2c0   : > { %s1260_s5 = sshll.u32 %s1014_s26, 4 }
 0x2c1   : > { %s1020_s16 = sadd.s32 %s2511_s9, %s1260_s5 }
 0x2c2   : > { %s1247_s11 = sshll.u32 %s1020_s16, 6 }
 0x2c3   : > { %s2322_s3 = scalar_lea.hbm %s2512_s22, %s1247_s11 }
 0x2c4   : > { %1608 = shalt.err (!%p1605_p4)
}
 0x2c5   : > { %s1609_s19 = scalar_lea.hbm %s2322_s3, 512  ;;  %s1613_s13 = scalar_lea.hbm %s2513_s6, 2048 }
 0x2c6   : > { %p1610_p5 = scmp.ne.s32.totalorder %s2322_s3, %s1609_s19  ;;  %p1614_p8 = scmp.lt.s32.totalorder %s2322_s3, %s2513_s6 }
 0x2c7   : > { %p1615_p1 = scmp.lt.s32.totalorder %s1613_s13, %s1609_s19 }
 0x2c8   : > { %p1611_p2 = pnand %p1610_p5, %p2509_p3 }
 0x2c9   : > { %p1616_p12 = por %p1615_p1, %p1614_p8 }
 0x2ca   : > { %p1612_p10 = pneg %p1611_p2 }
 0x2cc   : > { %p1617_p6 = pnand %p1616_p12, %p1612_p10 }
 0x2ce   : > { %1620 = shalt.err (!%p1617_p6)
}
 0x2cf   : > { %s1791_s17 = smov 64   ;;  %s1792_s26 = smov 128  }
 0x2d0   : > { %s1793_s5 = smov 4  }
 0x2d1   : > { %1346 = dma.vmem_to_hbm [thread:$0]  (%p2509_p3), %s2316_s15, 512, %s2322_s3, %s2326_s29, %s1791_s17, %s1792_s26, %s1793_s5  }
 0x2d2 PF: > { %s2515_s16 = sld [smem:[#allocation40_spill]]  ;;  %p1352_p7 = scmp.ge.s32.totalorder %s1777_s12, 2 }
 0x2d3   : > { %s1038_s11 = sand.u32 1, %s1709_s0  }
 0x2d4   : > { %s1039_s25 = scalar_lea.sflag [#allocation11], %s1038_s11 }
 0x2d8   : > { %p2516_p9 = scmp.ne.s32.totalorder %s2515_s16, 0 }
 0x2da   : > { %p1349_p11 = pnand %p1352_p7, %p2516_p9 }
 0x2dc   : > { %p1350_p13 = pneg %p1349_p11 }
 0x2de   : > { %1704 = dma.done.wait (%p1350_p13), %s1039_s25, 512  }
 0x2df   : > { %1706 = vsyncadd (%p1350_p13), %s1039_s25, 4294966784  ;;  %s37_s12 = sadd.s32 1, %s1777_s12   ;;  %s2518_s30 = sld [smem:[#allocation22_spill]] }
 0x2e0   : > { %p2354_p0 = scmp.ge.s32.totalorder %s37_s12, 22   ;;  %s2519_s20 = sld [smem:[#allocation41_spill]] }
 0x2e1   : > { %s2520_s15 = sld [smem:[#allocation38_spill]]  ;;  %s2530_s0 = smov %s1713_s1 }
 0x2e2   : > { %s2521_s22 = sld [smem:[#allocation23_spill]]  ;;  %s2533_s3 = smov %s1725_s21 }
 0x2e3   : > { %s2522_s23 = sld [smem:[#allocation24_spill]]  ;;  %s2534_s21 = smov %s1729_s2 }
 0x2e4   : > { %s2523_s24 = sld [smem:[#allocation37_spill]]  ;;  %s2536_s28 = smov %s1769_s10 }
 0x2e5   : > { %s2524_s25 = sld [smem:[#allocation26_spill]]  ;;  %s2532_s1 = smov %s2518_s30 }
 0x2e6   : > { %s2525_s26 = sld [smem:[#allocation36_spill]] }
 0x2e7   : > { %s2526_s27 = sld [smem:[#allocation30_spill]]  ;;  %s2535_s2 = smov %s2520_s15 }
 0x2e8   : > { %s2527_s29 = sld [smem:[#allocation31_spill]] }
 0x2e9   : > { %s2528_s19 = sld [smem:[#allocation32_spill]] }
 0x2ea   : > { %s2529_s18 = sld [smem:[#allocation33_spill]] }
 0x2eb   : > { %s2531_s11 = sld [smem:[#allocation34_spill]] }
 0x2ec   :  { %36 = sbr.rel (!%p2354_p0) target bundleno = 28 (0x1c), region = 181 }
 0x2ef   : > { %s2537_s30 = smov %s2528_s19 }
 0x2f0   : > { %s2538_s10 = smov %s2529_s18 }
 0x2f1   :  { %1044 = vsyncpa [#allocation10], 1 }
 0x2f2   :  { %1046 = vsyncpa [#allocation10 + $0x1], 1 }
 0x2f3   :  { %1047 = vsyncpa [#allocation13], 1 }
 0x2f4   :  { %1049 = vsyncpa [#allocation13 + $0x1], 1 }
 0x2f5   :  { %1050 = vsyncpa [#allocation11], 1 }
 0x2f6   :  { %1052 = vsyncpa [#allocation11 + $0x1], 1 }

</bundles_post_ra>
